<compile_context>
chip_gen: v7x
topology: tpu7x:2x2x1
jax: 0.10.0
libtpu: 0.0.40
codegen_flags: <defaults>
</compile_context>

<pallas_src>
import functools
import numpy as np

import jax
import jax.numpy as jnp
from jax import lax
from jax.experimental import pallas as pl
from jax.experimental.pallas import tpu as pltpu


# --------------------------------------------------------------------------
# Pallas kernels
# --------------------------------------------------------------------------
def _proj_kernel(x_ref, w_ref, b_ref, o_ref, *, n_parts):
    """Hoisted input projection: sum_p x[p] @ w[p] + b, bf16 MXU, f32 accumulate.

    x_ref: (n_parts, tm, F_part)   bf16 or f32 (cast to w dtype in-register)
    w_ref: (n_parts, F_part, D)    bf16   (D = num_dirs * 4H, bias already fused)
    b_ref: (1, D)                  f32
    o_ref: (tm, D)                 f32
    """
    wdt = w_ref.dtype
    acc = jnp.dot(x_ref[0].astype(wdt), w_ref[0],
                  preferred_element_type=jnp.float32)
    for p in range(1, n_parts):
        acc = acc + jnp.dot(x_ref[p].astype(wdt), w_ref[p],
                            preferred_element_type=jnp.float32)
    o_ref[...] = acc + b_ref[...]


def _lstm_recur_kernel(*refs, T, H, num_dirs, fuse_fc):
    """Fused fwd+bwd LSTM recurrence over precomputed input gates.

    inputs : gates (T, B, num_dirs*4H) f32, mask (T, B, 1) f32,
             whh_d (H, 4H) bf16 per direction,
             [fc_w (num_dirs*H, O) f32, fc_b (1, O) f32]      (last layer only)
    output : logits (B, O) if fuse_fc else seq (num_dirs, T, B, H) f32
    scratch: h_d, c_d (B, H) f32 per direction
    Gate columns are pre-packed as [i, f, o | g] (sigmoid block first, tanh block last).
    """
    gates_ref, mask_ref = refs[0], refs[1]
    idx = 2
    whh_refs = refs[idx:idx + num_dirs]
    idx += num_dirs
    if fuse_fc:
        fcw_ref, fcb_ref = refs[idx], refs[idx + 1]
        idx += 2
        logits_ref = refs[idx]
        idx += 1
    else:
        out_ref = refs[idx]
        idx += 1
    h_scr = refs[idx:idx + num_dirs]
    idx += num_dirs
    c_scr = refs[idx:idx + num_dirs]

    for d in range(num_dirs):
        h_scr[d][...] = jnp.zeros_like(h_scr[d])
        c_scr[d][...] = jnp.zeros_like(c_scr[d])

    G = 4 * H
    # Hoist the recurrent weights out of the serial loop (loop-invariant vregs).
    whh_mats = [whh_refs[d][...] for d in range(num_dirs)]

    def step(i, carry):
        # Interleave the independent directions for ILP on the serial chain.
        for d in range(num_dirs):
            t = i if d == 0 else T - 1 - i
            g_row = gates_ref[t]                              # (B, num_dirs*4H) f32
            g_in = g_row[:, d * G:(d + 1) * G]                # lane-tile aligned slice
            h_prev = h_scr[d][...]
            c_prev = c_scr[d][...]
            whh = whh_mats[d]
            g = g_in + jnp.dot(h_prev.astype(whh.dtype), whh,
                               preferred_element_type=jnp.float32)
            sig = jax.nn.sigmoid(g[:, :3 * H])                # i, f, o in one EUP pass
            i_g = sig[:, 0 * H:1 * H]
            f_g = sig[:, 1 * H:2 * H]
            o_g = sig[:, 2 * H:3 * H]
            g_g = jnp.tanh(g[:, 3 * H:4 * H])
            c_new = f_g * c_prev + i_g * g_g
            h_new = o_g * jnp.tanh(c_new)
            m = mask_ref[t]                                   # (B, 1) f32 arithmetic mask
            h_scr[d][...] = h_prev + m * (h_new - h_prev)
            c_scr[d][...] = c_prev + m * (c_new - c_prev)
            if not fuse_fc:
                out_ref[d, t] = m * h_new                     # padded steps -> zeros
        return carry

    lax.fori_loop(0, T, step, 0, unroll=True if T <= 32 else 8)

    if fuse_fc:
        # torch.cat([hidden[-1], hidden[-2]]) == [backward_final, forward_final]
        w = fcw_ref[...]
        if num_dirs == 2:
            logits = (jnp.dot(h_scr[1][...], w[:H], preferred_element_type=jnp.float32)
                      + jnp.dot(h_scr[0][...], w[H:], preferred_element_type=jnp.float32))
        else:
            logits = jnp.dot(h_scr[0][...], w, preferred_element_type=jnp.float32)
        logits_ref[...] = logits + fcb_ref[...]


# --------------------------------------------------------------------------
# Wrappers around pallas_call
# --------------------------------------------------------------------------
def input_projection(x_parts, w_parts, bias, *, tile_m=256):
    """x_parts (P, M, F), w_parts (P, F, D) bf16, bias (1, D) f32 -> (M, D) f32."""
    P, M, F = x_parts.shape
    D = w_parts.shape[2]
    tm = M if M <= tile_m else tile_m
    kernel = functools.partial(_proj_kernel, n_parts=P)
    return pl.pallas_call(
        kernel,
        out_shape=jax.ShapeDtypeStruct((M, D), jnp.float32),
        grid=(pl.cdiv(M, tm),),
        in_specs=[pl.BlockSpec((P, tm, F), lambda i: (0, i, 0)),
                  pl.BlockSpec((P, F, D), lambda i: (0, 0, 0)),
                  pl.BlockSpec((1, D), lambda i: (0, 0))],
        out_specs=pl.BlockSpec((tm, D), lambda i: (i, 0)),
        compiler_params=pltpu.CompilerParams(dimension_semantics=("parallel",)),
    )(x_parts, w_parts, bias)


def lstm_recurrence(gates, mask, whh_list, *, H, fc=None):
    """Run fused multi-direction recurrence; returns seq slabs or fused-FC logits."""
    T, B, _ = gates.shape
    num_dirs = len(whh_list)
    vmem = pl.BlockSpec(memory_space=pltpu.MemorySpace.VMEM)
    inputs = [gates, mask] + list(whh_list)
    if fc is not None:
        fc_w_t, fc_b = fc
        inputs += [fc_w_t, fc_b]
        out_shape = jax.ShapeDtypeStruct((B, fc_w_t.shape[1]), jnp.float32)
    else:
        out_shape = jax.ShapeDtypeStruct((num_dirs, T, B, H), jnp.float32)
    kernel = functools.partial(_lstm_recur_kernel, T=T, H=H,
                               num_dirs=num_dirs, fuse_fc=fc is not None)
    return pl.pallas_call(
        kernel,
        out_shape=out_shape,
        in_specs=[vmem] * len(inputs),
        out_specs=vmem,
        scratch_shapes=[pltpu.VMEM((B, H), jnp.float32)
                        for _ in range(2 * num_dirs)],
    )(*inputs)


# --------------------------------------------------------------------------
# Parameter init (PyTorch-style) + weight re-packing for the kernels
# --------------------------------------------------------------------------
def _reorder_gate_rows(w, H):
    # PyTorch gate-block order [i, f, g, o] -> kernel order [i, f, o, g]
    return jnp.concatenate([w[0:H], w[H:2 * H], w[3 * H:4 * H], w[2 * H:3 * H]], axis=0)


def init_params(key, vocab_size, embedding_dim, hidden_dim, output_size,
                n_layers, bidirectional, dropout_rate, pad_index,
                mxu_dtype=jnp.bfloat16):
    del dropout_rate  # TODO(synk): dropout is identity (eval-mode semantics)
    num_dirs = 2 if bidirectional else 1
    H = hidden_dim
    keys = iter(jax.random.split(key, 1 + 4 * n_layers * num_dirs + 2))

    emb = 0.1 * jax.random.normal(next(keys), (vocab_size, embedding_dim),
                                  dtype=jnp.float32)
    emb = emb.at[pad_index].set(0.0)          # nn.Embedding zeros the padding row
    emb = jnp.asarray(emb, mxu_dtype)         # gather emits MXU-ready bf16 directly

    k = 1.0 / np.sqrt(H)
    layers = []
    for layer in range(n_layers):
        in_size = embedding_dim if layer == 0 else H * num_dirs
        n_parts = 1 if layer == 0 else num_dirs
        part = in_size // n_parts
        wih_t_dirs, bias_dirs, whh_list = [], [], []
        for _ in range(num_dirs):
            w_ih = jax.random.uniform(next(keys), (4 * H, in_size), minval=-k, maxval=k)
            w_hh = jax.random.uniform(next(keys), (4 * H, H), minval=-k, maxval=k)
            b_ih = jax.random.uniform(next(keys), (4 * H,), minval=-k, maxval=k)
            b_hh = jax.random.uniform(next(keys), (4 * H,), minval=-k, maxval=k)
            wih_t_dirs.append(_reorder_gate_rows(w_ih, H).T)          # (in_size, 4H)
            bias_dirs.append(_reorder_gate_rows(b_ih + b_hh, H))      # (4H,)
            whh_list.append(jnp.asarray(_reorder_gate_rows(w_hh, H).T, mxu_dtype))
        w_in_full = jnp.concatenate(wih_t_dirs, axis=1)               # (in_size, nd*4H)
        w_in = jnp.stack([w_in_full[p * part:(p + 1) * part] for p in range(n_parts)])
        layers.append(dict(
            w_in=jnp.asarray(w_in, mxu_dtype),                        # (n_parts, part, nd*4H)
            bias=jnp.asarray(jnp.concatenate(bias_dirs)[None, :], jnp.float32),
            whh=whh_list,                                             # list of (H, 4H) bf16
        ))

    fc_in = H * num_dirs
    kf = 1.0 / np.sqrt(fc_in)
    fc_w = jax.random.uniform(next(keys), (output_size, fc_in), minval=-kf, maxval=kf)
    fc_b = jax.random.uniform(next(keys), (output_size,), minval=-kf, maxval=kf)
    return dict(embedding=emb, layers=layers,
                fc_w_t=jnp.asarray(fc_w.T, jnp.float32),
                fc_b=jnp.asarray(fc_b[None, :], jnp.float32),
                n_layers=n_layers, num_dirs=num_dirs,
                hidden_dim=H, mxu_dtype=mxu_dtype)


# --------------------------------------------------------------------------
# Forward pass
# --------------------------------------------------------------------------
def lstm_model_forward(params, ids, lengths):
    """ids: (B, T) int32, lengths: (B,) int32 -> (B, output_size) float32."""
    n_layers, num_dirs = params["n_layers"], params["num_dirs"]
    H = params["hidden_dim"]
    B, T = ids.shape

    # Embedding gather directly in time-major order (bf16 table -> bf16 activations);
    # dropout = identity (eval mode).
    x_parts = params["embedding"][ids.T].reshape(1, T * B, -1)
    mask = (jnp.arange(T, dtype=jnp.int32)[:, None]
            < lengths[None, :].astype(jnp.int32)).astype(jnp.float32)[:, :, None]

    out = None
    for layer in range(n_layers):
        lp = params["layers"][layer]
        gates = input_projection(x_parts, lp["w_in"], lp["bias"])       # (T*B, nd*4H) f32
        gates = gates.reshape(T, B, num_dirs * 4 * H)
        last = layer == n_layers - 1
        fc = (params["fc_w_t"], params["fc_b"]) if last else None
        out = lstm_recurrence(gates, mask, lp["whh"], H=H, fc=fc)
        if not last:
            # (num_dirs, T, B, H) f32 -> per-direction slabs; cast to bf16 happens
            # in-register inside the next projection kernel (no extra HBM pass).
            x_parts = out.reshape(num_dirs, T * B, H)
    return out


# --------------------------------------------------------------------------
# Pure-JAX reference (same math / same mixed precision) for correctness check
# --------------------------------------------------------------------------
def ref_forward(params, ids, lengths):
    n_layers, num_dirs = params["n_layers"], params["num_dirs"]
    H, mdt = params["hidden_dim"], params["mxu_dtype"]
    B, T = ids.shape
    G = 4 * H
    x_parts = params["embedding"][ids.T].reshape(1, T * B, -1)
    mask = (jnp.arange(T)[:, None] < lengths[None, :]).astype(jnp.float32)[:, :, None]

    for layer in range(n_layers):
        lp = params["layers"][layer]
        acc = sum(jnp.dot(x_parts[p].astype(mdt), lp["w_in"][p],
                          preferred_element_type=jnp.float32)
                  for p in range(x_parts.shape[0]))
        gates = (acc + lp["bias"]).reshape(T, B, num_dirs * G)
        h = [jnp.zeros((B, H), jnp.float32) for _ in range(num_dirs)]
        c = [jnp.zeros((B, H), jnp.float32) for _ in range(num_dirs)]
        outs = [[None] * T for _ in range(num_dirs)]
        for i in range(T):
            for d in range(num_dirs):
                t = i if d == 0 else T - 1 - i
                g = gates[t, :, d * G:(d + 1) * G] + jnp.dot(
                    h[d].astype(mdt), lp["whh"][d], preferred_element_type=jnp.float32)
                sig = jax.nn.sigmoid(g[:, :3 * H])
                i_g, f_g, o_g = sig[:, :H], sig[:, H:2 * H], sig[:, 2 * H:3 * H]
                g_g = jnp.tanh(g[:, 3 * H:])
                c_new = f_g * c[d] + i_g * g_g
                h_new = o_g * jnp.tanh(c_new)
                m = mask[t]
                h[d] = h[d] + m * (h_new - h[d])
                c[d] = c[d] + m * (c_new - c[d])
                outs[d][t] = m * h_new
        if layer == n_layers - 1:
            hid = jnp.concatenate([h[1], h[0]], -1) if num_dirs == 2 else h[0]
            return hid @ params["fc_w_t"] + params["fc_b"]
        x_parts = jnp.stack([jnp.stack(o) for o in outs]).reshape(num_dirs, T * B, H)


# --------------------------------------------------------------------------
if __name__ == "__main__":
    VOCAB, EMB, HID, OUT = 50, 32, 32, 4
    N_LAYERS, BIDIR, DROPOUT, PAD = 2, True, 0.5, 0
    B, T = 2, 8

    key = jax.random.PRNGKey(0)
    kp, kids = jax.random.split(key)
    params = init_params(kp, VOCAB, EMB, HID, OUT, N_LAYERS, BIDIR, DROPOUT, PAD)

    lengths = jnp.array([8, 5], dtype=jnp.int32)
    ids = jax.random.randint(kids, (B, T), 1, VOCAB, dtype=jnp.int32)
    pos = jnp.arange(T)[None, :]
    ids = jnp.where(pos < lengths[:, None], ids, PAD)   # padded batch, pad_index rows

    pred = jax.block_until_ready(lstm_model_forward(params, ids, lengths))
    ref = jax.block_until_ready(ref_forward(params, ids, lengths))

    assert pred.shape == (B, OUT)
    np.testing.assert_allclose(np.asarray(pred), np.asarray(ref),
                               rtol=1e-3, atol=1e-3)
    print("KERNEL_OK")
</pallas_src>

<mosaic_0001>
module attributes {stable_mosaic.version = 11 : i64} {
  func.func @_proj_kernel(%arg0: i32, %arg1: memref<1x16x32xbf16, #tpu.memory_space<vmem>>, %arg2: memref<1x32x256xbf16, #tpu.memory_space<vmem>>, %arg3: memref<1x256xf32, #tpu.memory_space<vmem>>, %arg4: memref<16x256xf32, #tpu.memory_space<vmem>>) attributes {dimension_semantics = [#tpu.dimension_semantics<parallel>], iteration_bounds = array<i64: 1>, scalar_prefetch = 0 : i64, scratch_operands = 0 : i64, tpu.core_type = #tpu.core_type<tc>, window_params = [{transform_indices = @transform_0, window_bounds = array<i64: 1, 16, 32>}, {pipeline_mode = #tpu.pipeline_mode<synchronous>, transform_indices = @transform_1, window_bounds = array<i64: 1, 32, 256>}, {pipeline_mode = #tpu.pipeline_mode<synchronous>, transform_indices = @transform_2, window_bounds = array<i64: 1, 256>}, {transform_indices = @transform_3, window_bounds = array<i64: 16, 256>}]} {
    %c0 = arith.constant 0 : index
    %c0_0 = arith.constant 0 : index
    %c0_1 = arith.constant 0 : index
    %0 = vector.load %arg1[%c0, %c0_0, %c0_1] : memref<1x16x32xbf16, #tpu.memory_space<vmem>>, vector<1x16x32xbf16>
    %1 = vector.shape_cast %0 : vector<1x16x32xbf16> to vector<16x32xbf16>
    %c0_2 = arith.constant 0 : index
    %c0_3 = arith.constant 0 : index
    %c0_4 = arith.constant 0 : index
    %2 = vector.load %arg2[%c0_2, %c0_3, %c0_4] : memref<1x32x256xbf16, #tpu.memory_space<vmem>>, vector<1x32x256xbf16>
    %3 = vector.shape_cast %2 : vector<1x32x256xbf16> to vector<32x256xbf16>
    %cst = arith.constant dense<0.000000e+00> : vector<16x256xf32>
    %4 = tpu.matmul %1, %3, %cst {dimension_numbers = #tpu.dot_dimension_numbers<[1], [0], [0], [1], [0, 0, 1, 1], [], []>} : vector<16x32xbf16>, vector<32x256xbf16>, vector<16x256xf32> -> vector<16x256xf32>
    %c0_5 = arith.constant 0 : index
    %c0_6 = arith.constant 0 : index
    %5 = vector.load %arg3[%c0_5, %c0_6] : memref<1x256xf32, #tpu.memory_space<vmem>>, vector<1x256xf32>
    %6 = vector.broadcast %5 : vector<1x256xf32> to vector<16x256xf32>
    %7 = arith.addf %4, %6 : vector<16x256xf32>
    %c0_7 = arith.constant 0 : index
    %c0_8 = arith.constant 0 : index
    %8 = vector.load %arg4[%c0_7, %c0_8] : memref<16x256xf32, #tpu.memory_space<vmem>>, vector<16x256xf32>
    tpu.vector_store %arg4[%c0_7, %c0_8], %7 {strides = array<i32>} : memref<16x256xf32, #tpu.memory_space<vmem>>, vector<16x256xf32>,
    return
  }
  func.func @transform_0(%arg0: i32) -> (i32, i32, i32) {
    %c0_i32 = arith.constant 0 : i32
    %c0_i32_0 = arith.constant 0 : i32
    %c0_i32_1 = arith.constant 0 : i32
    return %c0_i32, %arg0, %c0_i32_0 : i32, i32, i32
  }
  func.func @transform_1(%arg0: i32) -> (i32, i32, i32) {
    %c0_i32 = arith.constant 0 : i32
    %c0_i32_0 = arith.constant 0 : i32
    %c0_i32_1 = arith.constant 0 : i32
    %c0_i32_2 = arith.constant 0 : i32
    return %c0_i32, %c0_i32_0, %c0_i32_1 : i32, i32, i32
  }
  func.func @transform_2(%arg0: i32) -> (i32, i32) {
    %c0_i32 = arith.constant 0 : i32
    %c0_i32_0 = arith.constant 0 : i32
    %c0_i32_1 = arith.constant 0 : i32
    return %c0_i32, %c0_i32_0 : i32, i32
  }
  func.func @transform_3(%arg0: i32) -> (i32, i32) {
    %c0_i32 = arith.constant 0 : i32
    %c0_i32_0 = arith.constant 0 : i32
    return %arg0, %c0_i32 : i32, i32
  }
}

</mosaic_0001>

<bundles_post_ra>
// kernel: tpu_custom_call.1
= control target key start
LH: loop header
LB: loop body
LE: loop exit
PB: predicated region body
PF: predicated region fallthrough
CT: control target
= control target key end

     0   :  { %8 = vsyncpa [#allocation3], 0  ;;  %s320_s0 = inlined_call_operand.hbm [shape: bf16[1,16,32], index: 0, kind: input, shape index: {}]   ;;  %s321_s1 = inlined_call_operand.hbm [shape: bf16[1,32,256], index: 1, kind: input, shape index: {}]   ;;  %s322_s2 = inlined_call_operand.vmem [shape: f32[1,256], index: 2, kind: input, shape index: {}]   ;;  %s323_s3 = inlined_call_operand.hbm [shape: f32[16,256], index: 3, kind: output, shape index: {}]  }
   0x1   :  { %9 = vsyncpa [#allocation6], 0 }
   0x2   :  { %10 = vsyncpa [#allocation4], 0  ;;  %s251_s12 = smov [#allocation2]   ;;  %s179_s16 = scalar_lea.hbm %s320_s0, 128 }
   0x3   :  { %s16_s13 = sshll.u32 %s251_s12, 4  ;;  %p180_p0 = scmp.ne.s32.totalorder %s320_s0, %s179_s16  ;;  %s17_s13 = int_to_ptr.vmem [resolvable:$true] %s16_s13 }
   0x4   :  { %p183_p1 = scmp.lt.u32.totalorder %s179_s16, %s320_s0 }
   0x6   :  { %p185_p2 = pnand %p183_p1, %p180_p0 }
   0x8   :  { %188 = shalt.err (!%p185_p2)
}
   0x9   :  { %s189_s21 = scalar_lea.vmem %s17_s13, 128  ;;  %p194_p4 = scmp.lt.s32.totalorder %s17_s13, %s17_s13 }
   0xa   :  { %p190_p3 = scmp.ne.s32.totalorder %s17_s13, %s189_s21  ;;  %p195_p5 = scmp.lt.s32.totalorder %s189_s21, %s189_s21 }
   0xc   :  { %p196_p6 = por %p195_p5, %p194_p4 }
   0xe   :  { %p197_p7 = pnand %p196_p6, %p190_p3 }
  0x10   :  { %200 = shalt.err (!%p197_p7)
}
  0x11   :  { %s252_s22 = smov 64   ;;  %s253_s23 = smov 4  }
  0x12   :  { %22 = dma.hbm_to_vmem [thread:$0]  %s320_s0, 128, %s17_s13, [#allocation3], %s252_s22, %s252_s22, %s253_s23  }
  0x13   :  { %s254_s26 = smov [#allocation5]   ;;  %s201_s30 = scalar_lea.hbm %s321_s1, 512 }
  0x14   :  { %s28_s27 = sshll.u32 %s254_s26, 4  ;;  %p202_p8 = scmp.ne.s32.totalorder %s321_s1, %s201_s30  ;;  %s29_s27 = int_to_ptr.vmem [resolvable:$true] %s28_s27 }
  0x15   :  { %p205_p9 = scmp.lt.u32.totalorder %s201_s30, %s321_s1 }
  0x17   :  { %p207_p10 = pnand %p205_p9, %p202_p8 }
  0x19   :  { %210 = shalt.err (!%p207_p10)
}
  0x1a   :  { %s211_s8 = scalar_lea.vmem %s29_s27, 512  ;;  %p216_p12 = scmp.lt.s32.totalorder %s29_s27, %s29_s27 }
  0x1b   :  { %p212_p11 = scmp.ne.s32.totalorder %s29_s27, %s211_s8  ;;  %p217_p13 = scmp.lt.s32.totalorder %s211_s8, %s211_s8 }
  0x1d   :  { %p218_p0 = por %p217_p13, %p216_p12 }
  0x1f   :  { %p219_p1 = pnand %p218_p0, %p212_p11 }
  0x21   :  { %222 = shalt.err (!%p219_p1)
}
  0x22   :  { %s255_s0 = smov 128   ;;  %s256_s9 = smov 8  }
  0x23   :  { %34 = dma.hbm_to_vmem [thread:$0]  %s321_s1, 512, %s29_s27, [#allocation6], %s255_s0, %s255_s0, %s256_s9  }
  0x24   :  { %245 = dma.done.wait [#allocation3], 128  }
  0x25   :  { %246 = vsyncadd [#allocation3], 4294967168 }
  0x26   :  { %247 = dma.done.wait [#allocation6], 512  }
  0x27   :  { %248 = vsyncadd [#allocation6], 4294966784  ;;  %v257_v0 = vmov 0   ;;  %v172_v1 = vld [vmem:[#allocation5 + $0x4] ss:$8 sps:$4 sm:$0xff]   ;;  %v178_v5 = vld [vmem:[#allocation2] sm:$0xff]   ;;  %v52_v6 = vlaneseq }
  0x28   :  { %123 = vmatprep.mubr.bf16.mxu0 %v257_v0  ;;  %v174_v2 = vld [vmem:[#allocation5] ss:$8 sps:$4 sm:$0xff]   ;;  %91 = vmatprep.subr.bf16.mxu0 %v172_v1  ;;  %v175_v3 = vld [vmem:[#allocation5 + $0x14] ss:$8 sps:$4 sm:$0xff]   ;;  %v177_v4 = vld [vmem:[#allocation5 + $0x10] ss:$8 sps:$4 sm:$0xff]  }
  0x29   :  { %92 = vmatpush1.bf16.msra.mxu0 %v174_v2  ;;  %vm87_vm0 = vcmask 261120   ;;  %v53_v7 = vshrl.u32 %v52_v6, 7  ;;  %v50_v9 = vld [vmem:[%s322_s2] sm:$0x3]  ;;  %s258_s13 = smov [#allocation7]  }
  0x2a   :  { %93 = vmatprep.subr.bf16.mxu0 %v175_v3  ;;  %s143_s14 = sshll.u32 %s258_s13, 4  ;;  %s144_s14 = int_to_ptr.vmem [resolvable:$true] %s143_s14 }
  0x2b   :  { %v54_v8 = vsub.s32 0, %v53_v7  ;;  %v58_v10 = vsub.s32 1, %v53_v7  ;;  %s223_s15 = scalar_lea.vmem %s144_s14, 512  ;;  %p228_p3 = scmp.lt.s32.totalorder %s144_s14, %s144_s14 }
  0x2c   :  { %p224_p2 = scmp.ne.s32.totalorder %s144_s14, %s223_s15  ;;  %p229_p4 = scmp.lt.s32.totalorder %s223_s15, %s223_s15 }
  0x2d   :  { %94 = vmatpush1.bf16.msra.mxu0 %v177_v4  ;;  %v55_v11 = vrot.slane %v50_v9, %v54_v8  ;;  %v59_v12 = vrot.slane %v50_v9, %v58_v10 }
  0x2e   :  { %p230_p5 = por %p229_p4, %p228_p3 }
  0x30   :  { %161 = vmatmul.mubr.msk.bf16.vlgmr.msra.gmra.mrb[0].mxu0 %vm87_vm0, %v178_v5  ;;  %p231_p6 = pnand %p230_p5, %p224_p2 }
 0x103   :  { %v125_v13 = vpop.f32.mrb[0].mxu0 }
 0x104   :  { %v126_v14 = vadd.f32 %v125_v13, %v55_v11  ;;  %v127_v15 = vpop.f32.mrb[1].mxu0 }
 0x105   :  { %v128_v16 = vadd.f32 %v127_v15, %v59_v12  ;;  %v129_v17 = vpop.f32.mrb[2].mxu0 }
 0x106   :  { %134 = vst [vmem:[#allocation7] sm:$0xff] %v126_v14  ;;  %v130_v18 = vadd.f32 %v129_v17, %v55_v11  ;;  %v131_v19 = vpop.f32.mrb[3].mxu0 }
 0x107   :  { %135 = vst [vmem:[#allocation7 + $0x8] sm:$0xff] %v128_v16  ;;  %v132_v20 = vadd.f32 %v131_v19, %v59_v12 }
 0x108   :  { %136 = vst [vmem:[#allocation7 + $0x10] sm:$0xff] %v130_v18 }
 0x109   :  { %137 = vst [vmem:[#allocation7 + $0x18] sm:$0xff] %v132_v20 }
 0x10a   :  { %234 = shalt.err (!%p231_p6)
}
 0x10b   :  { %s235_s17 = scalar_lea.hbm %s323_s3, 512 }
 0x10c   :  { %p236_p7 = scmp.ne.s32.totalorder %s323_s3, %s235_s17  ;;  %p239_p8 = scmp.lt.u32.totalorder %s235_s17, %s323_s3 }
 0x10e   :  { %p241_p9 = pnand %p239_p8, %p236_p7 }
 0x110   :  { %244 = shalt.err (!%p241_p9)
}
 0x111   :  { %s259_s22 = smov 256   ;;  %s260_s23 = smov 16  }
 0x112   :  { %149 = dma.vmem_to_hbm [thread:$0]  %s144_s14, 512, %s323_s3, [#allocation4], %s259_s22, %s259_s22, %s260_s23  }
 0x113   :  { %249 = dma.done.wait [#allocation4], 512  }
 0x114   :  { %250 = vsyncadd [#allocation4], 4294966784 }
 0x115   :  { %153 = vsyncpa [#allocation3], 1 }
 0x116   :  { %154 = vsyncpa [#allocation6], 1 }
 0x117   :  { %155 = vsyncpa [#allocation4], 1 }

</bundles_post_ra>
